<compile_context>
chip_gen: v7x
topology: tpu7x:2x2x1
jax: 0.10.0
libtpu: 0.0.40
codegen_flags: <defaults>
</compile_context>

<pallas_src>
import numpy as np
import jax
import jax.numpy as jnp
from jax.experimental import pallas as pl
from jax.experimental.pallas import tpu as pltpu

EPS = 1e-7  # matches Normalize(2): x.div(norm + 1e-7)


def _round_up(x, m):
    return (x + m - 1) // m * m


def _row_tile(n, tile_n):
    """Row tile: multiple of 8, <= tile_n; force >= 2 grid steps when possible
    so both v7x TensorCores get work on the 'parallel' grid axis."""
    if n <= 8:
        return max(n, 1)
    tile = min(tile_n, _round_up(n, 8))
    if pl.cdiv(n, tile) == 1:
        tile = _round_up(pl.cdiv(n, 2), 8)
    return tile


_DEFAULT_SCOPED_VMEM = 32 * 1024 * 1024


def _vmem_limit(nbytes):
    """Raise the scoped-VMEM limit only if the working set needs it; keep the
    request <= 64 MiB so it is also valid on v7x (64 MiB physical VMEM)."""
    need = int(nbytes * 1.25)
    if need <= _DEFAULT_SCOPED_VMEM:
        return None
    return min(need, 64 * 1024 * 1024)


# ----------------------------- Pallas kernels ------------------------------


def _mlp_l2norm_kernel(x_ref, w1_ref, b1_ref, w2_ref, b2_ref, o_ref):
    """y = Linear2(ReLU(Linear1(x))); out = y / (||y||_2 + eps), row-wise.

    Matmul operands in bf16 (MXU-native on v6e/v7x), f32 accumulation; all
    vector / EUP math in f32 (v5e has no bf16 VPU/EUP path)."""
    x = x_ref[...].astype(jnp.bfloat16)
    w1 = w1_ref[...].astype(jnp.bfloat16)
    w2 = w2_ref[...].astype(jnp.bfloat16)
    h = jnp.dot(x, w1, preferred_element_type=jnp.float32) + b1_ref[...]
    h = jnp.maximum(h, 0.0)
    y = jnp.dot(h.astype(jnp.bfloat16), w2,
                preferred_element_type=jnp.float32) + b2_ref[...]
    norm = jnp.sqrt(jnp.sum(y * y, axis=-1, keepdims=True))
    inv = pl.reciprocal(norm + EPS, approx=True)  # EUP slot, frees VALU
    o_ref[...] = (y * inv).astype(o_ref.dtype)


def _l2norm_kernel(x_ref, o_ref):
    """out = x / (||x||_2 + eps), row-wise (Normalize(power=2))."""
    x = x_ref[...].astype(jnp.float32)
    norm = jnp.sqrt(jnp.sum(x * x, axis=-1, keepdims=True))
    inv = pl.reciprocal(norm + EPS, approx=True)
    o_ref[...] = (x * inv).astype(o_ref.dtype)


# ------------------------------ pallas_call wrappers ------------------------


def mlp_l2norm(x, w1, b1, w2, b2, *, tile_n=256):
    """Fused Linear->ReLU->Linear->L2norm over rows: (n, c) -> (n, nc).

    No padded copies of the activation: rows tiled with a ragged last block,
    c / nc are full-extent last block dims; weights stay resident in VMEM."""
    n, c = x.shape
    nc = w2.shape[1]
    tile = _row_tile(n, tile_n)
    grid = pl.cdiv(n, tile)

    cost = pl.CostEstimate(
        flops=int(2 * n * (c * nc + nc * nc) + 6 * n * nc),
        transcendentals=int(2 * n),
        bytes_accessed=int(4 * (n * c + n * nc + c * nc + nc * nc + 2 * nc)),
    )
    # double-buffered x/out tiles + resident weights/biases (f32 in VMEM)
    vmem_bytes = 4 * (2 * tile * c + 2 * tile * nc + c * nc + nc * nc + 2 * nc)

    return pl.pallas_call(
        _mlp_l2norm_kernel,
        out_shape=jax.ShapeDtypeStruct((n, nc), x.dtype),
        grid=(grid,),
        in_specs=[
            pl.BlockSpec((tile, c), lambda i: (i, 0)),
            pl.BlockSpec((c, nc), lambda i: (0, 0)),
            pl.BlockSpec((1, nc), lambda i: (0, 0)),
            pl.BlockSpec((nc, nc), lambda i: (0, 0)),
            pl.BlockSpec((1, nc), lambda i: (0, 0)),
        ],
        out_specs=pl.BlockSpec((tile, nc), lambda i: (i, 0)),
        compiler_params=pltpu.CompilerParams(
            dimension_semantics=("parallel",),
            vmem_limit_bytes=_vmem_limit(vmem_bytes),
        ),
        cost_estimate=cost,
    )(x, w1, b1, w2, b2)


def l2norm_rows(x, *, tile_n=256):
    """Row-wise L2 normalization: (n, c) -> (n, c)."""
    n, c = x.shape
    tile = _row_tile(n, tile_n)
    grid = pl.cdiv(n, tile)

    cost = pl.CostEstimate(
        flops=int(3 * n * c),
        transcendentals=int(2 * n),
        bytes_accessed=int(4 * 2 * n * c),
    )
    vmem_bytes = 4 * (2 * tile * c) * 2  # double-buffered in + out tiles

    return pl.pallas_call(
        _l2norm_kernel,
        out_shape=jax.ShapeDtypeStruct((n, c), x.dtype),
        grid=(grid,),
        in_specs=[pl.BlockSpec((tile, c), lambda i: (i, 0))],
        out_specs=pl.BlockSpec((tile, c), lambda i: (i, 0)),
        compiler_params=pltpu.CompilerParams(
            dimension_semantics=("parallel",),
            vmem_limit_bytes=_vmem_limit(vmem_bytes),
        ),
        cost_estimate=cost,
    )(x)


# ----------------------- jitted per-level pipelines --------------------------
# One jit per level keeps gather + transpose + kernel in a single XLA program
# (single dispatch, fused layout ops).


@jax.jit
def _level_mlp(feat, patch_id, w1, b1, w2, b2):
    b, c, h, w = feat.shape
    # Gather BEFORE transpose: only the P sampled pixels are re-laid-out.
    sampled = jnp.take(feat.reshape(b, c, h * w), patch_id, axis=2)  # (b, c, P)
    x = jnp.transpose(sampled, (0, 2, 1)).reshape(-1, c)             # (b*P, c)
    return mlp_l2norm(x, w1, b1, w2, b2, tile_n=256)


@jax.jit
def _level_plain(feat, patch_id):
    b, c, h, w = feat.shape
    sampled = jnp.take(feat.reshape(b, c, h * w), patch_id, axis=2)
    x = jnp.transpose(sampled, (0, 2, 1)).reshape(-1, c)
    return l2norm_rows(x, tile_n=256)


@jax.jit
def _level_mlp_all(feat, w1, b1, w2, b2):
    b, c, h, w = feat.shape
    x = jnp.transpose(feat, (0, 2, 3, 1)).reshape(-1, c)
    y = mlp_l2norm(x, w1, b1, w2, b2, tile_n=1024)
    nc = y.shape[-1]
    # Intended num_patches==0 epilogue: (B, H*W, C') -> (B, C', H, W).
    return jnp.transpose(y.reshape(b, h * w, nc), (0, 2, 1)).reshape(b, nc, h, w)


@jax.jit
def _level_plain_all(feat):
    b, c, h, w = feat.shape
    x = jnp.transpose(feat, (0, 2, 3, 1)).reshape(-1, c)
    y = l2norm_rows(x, tile_n=1024)
    return jnp.transpose(y.reshape(b, h * w, c), (0, 2, 1)).reshape(b, c, h, w)


# ------------------------------- module port --------------------------------


class PatchSampleF:
    """JAX/Pallas port of PatchSampleF."""

    def __init__(self, use_mlp=False, init_type="normal", init_gain=0.02,
                 nc=256, seed=0):
        self.use_mlp = use_mlp
        self.nc = nc
        self.mlp_init = False
        self.init_type = init_type
        self.init_gain = init_gain
        self.seed = seed
        self.mlps = []

    def create_mlp(self, feat_channels):
        # init_net with init_type='normal': weights ~ N(0, init_gain), biases 0.
        key = jax.random.PRNGKey(self.seed)
        params = []
        for c in feat_channels:
            key, k1, k2 = jax.random.split(key, 3)
            w1 = jax.random.normal(k1, (c, self.nc), jnp.float32) * self.init_gain
            b1 = jnp.zeros((1, self.nc), jnp.float32)
            w2 = jax.random.normal(k2, (self.nc, self.nc), jnp.float32) * self.init_gain
            b2 = jnp.zeros((1, self.nc), jnp.float32)
            params.append((w1, b1, w2, b2))
        self.mlps = params
        self.mlp_init = True

    def forward(self, feats, num_patches=64, patch_ids=None):
        return_ids = []
        return_feats = []
        if self.use_mlp and not self.mlp_init:
            # Reference passes the tensors to create_mlp and uses the tensor as
            # input_nc (latent bug); the intended value is the channel count.
            self.create_mlp([int(f.shape[1]) for f in feats])
        for feat_id, feat in enumerate(feats):
            b, c, h, w = feat.shape
            if num_patches > 0:
                if patch_ids is not None:
                    patch_id = jnp.asarray(patch_ids[feat_id], dtype=jnp.int32)
                else:
                    # Host-side numpy permutation, resampled each call — same
                    # behaviour as the PyTorch reference.
                    pid = np.random.permutation(h * w)[: int(min(num_patches, h * w))]
                    patch_id = jnp.asarray(pid, dtype=jnp.int32)
                if self.use_mlp:
                    w1, b1, w2, b2 = self.mlps[feat_id]
                    x_sample = _level_mlp(feat, patch_id, w1, b1, w2, b2)
                else:
                    x_sample = _level_plain(feat, patch_id)
            else:
                # TODO(synk): reference epilogue references undefined B/H/W
                # (latent bug); we implement the intended (B, C', H, W) reshape.
                patch_id = []
                if self.use_mlp:
                    w1, b1, w2, b2 = self.mlps[feat_id]
                    x_sample = _level_mlp_all(feat, w1, b1, w2, b2)
                else:
                    x_sample = _level_plain_all(feat)
            return_ids.append(patch_id)
            return_feats.append(x_sample)
        return return_feats, return_ids


# ---------------------------------- main ------------------------------------


if __name__ == "__main__":
    key = jax.random.PRNGKey(0)
    k0, k1, kp0, kp1 = jax.random.split(key, 4)

    # Two feature maps (NCHW), small shapes.
    feat0 = jax.random.normal(k0, (2, 16, 16, 16), jnp.float32)  # B=2,C=16,H=W=16
    feat1 = jax.random.normal(k1, (2, 32, 8, 8), jnp.float32)    # B=2,C=32,H=W=8
    feats = [feat0, feat1]

    num_patches = 64
    patch_ids = [
        jax.random.permutation(kp0, 16 * 16)[:num_patches],
        jax.random.permutation(kp1, 8 * 8)[:num_patches],
    ]

    # MLP path: fused Linear -> ReLU -> Linear -> L2 norm kernel.
    sampler_mlp = PatchSampleF(use_mlp=True, nc=32, init_gain=0.02, seed=0)
    feats_out, ids_out = sampler_mlp.forward(feats, num_patches=num_patches,
                                             patch_ids=patch_ids)
    for f in feats_out:
        jax.block_until_ready(f)
    assert feats_out[0].shape == (2 * num_patches, 32)
    assert feats_out[1].shape == (2 * num_patches, 32)

    # Plain path (use_mlp=False): gather + L2 norm kernel only.
    sampler_plain = PatchSampleF(use_mlp=False)
    feats_out2, _ = sampler_plain.forward(feats, num_patches=num_patches,
                                          patch_ids=patch_ids)
    for f in feats_out2:
        jax.block_until_ready(f)
    assert feats_out2[0].shape == (2 * num_patches, 16)
    assert feats_out2[1].shape == (2 * num_patches, 32)

    # num_patches == 0 paths (full-map normalization, reshaped back to NCHW).
    feats_out3, _ = sampler_plain.forward([feat0], num_patches=0)
    jax.block_until_ready(feats_out3[0])
    assert feats_out3[0].shape == (2, 16, 16, 16)
    feats_out4, _ = sampler_mlp.forward([feat0], num_patches=0)
    jax.block_until_ready(feats_out4[0])
    assert feats_out4[0].shape == (2, 32, 16, 16)

    # ---- Correctness: MLP path, level 0, vs pure-JAX references. ----
    w1, b1, w2, b2 = sampler_mlp.mlps[0]
    fr = jnp.transpose(feat0, (0, 2, 3, 1)).reshape(2, 16 * 16, 16)
    xs = jnp.take(fr, patch_ids[0], axis=1).reshape(-1, 16)

    # Exact f32 reference (kernel uses bf16 MXU operands -> loose tolerance).
    hh = jnp.maximum(xs @ w1 + b1, 0.0)
    yy = hh @ w2 + b2
    ref = yy / (jnp.sqrt(jnp.sum(yy * yy, axis=-1, keepdims=True)) + EPS)
    assert jnp.allclose(ref, feats_out[0], atol=2e-2)

    # bf16-matched reference (same matmul precision as the kernel).
    hb = jnp.maximum(
        jnp.dot(xs.astype(jnp.bfloat16), w1.astype(jnp.bfloat16),
                preferred_element_type=jnp.float32) + b1, 0.0)
    yb = jnp.dot(hb.astype(jnp.bfloat16), w2.astype(jnp.bfloat16),
                 preferred_element_type=jnp.float32) + b2
    refb = yb / (jnp.sqrt(jnp.sum(yb * yb, axis=-1, keepdims=True)) + EPS)
    assert jnp.allclose(refb, feats_out[0], atol=5e-3)

    # Plain path: rows unit-norm and equal to direct normalization.
    nrm = jnp.linalg.norm(feats_out2[0], axis=-1)
    assert jnp.allclose(nrm, 1.0, atol=5e-3)
    ref2 = xs / (jnp.sqrt(jnp.sum(xs * xs, axis=-1, keepdims=True)) + EPS)
    assert jnp.allclose(ref2, feats_out2[0], atol=5e-3)

    print("KERNEL_OK")
</pallas_src>

<mosaic_0001>
module attributes {stable_mosaic.version = 11 : i64} {
  func.func @_mlp_l2norm_kernel(%arg0: i32, %arg1: memref<64x16xf32, #tpu.memory_space<vmem>>, %arg2: memref<16x32xf32, #tpu.memory_space<vmem>>, %arg3: memref<1x32xf32, #tpu.memory_space<vmem>>, %arg4: memref<32x32xf32, #tpu.memory_space<vmem>>, %arg5: memref<1x32xf32, #tpu.memory_space<vmem>>, %arg6: memref<64x32xf32, #tpu.memory_space<vmem>>) attributes {dimension_semantics = [#tpu.dimension_semantics<parallel>], iteration_bounds = array<i64: 2>, scalar_prefetch = 0 : i64, scratch_operands = 0 : i64, tpu.core_type = #tpu.core_type<tc>, window_params = [{transform_indices = @transform_0, window_bounds = array<i64: 64, 16>}, {pipeline_mode = #tpu.pipeline_mode<synchronous>, transform_indices = @transform_1, window_bounds = array<i64: 16, 32>}, {pipeline_mode = #tpu.pipeline_mode<synchronous>, transform_indices = @transform_2, window_bounds = array<i64: 1, 32>}, {pipeline_mode = #tpu.pipeline_mode<synchronous>, transform_indices = @transform_3, window_bounds = array<i64: 32, 32>}, {pipeline_mode = #tpu.pipeline_mode<synchronous>, transform_indices = @transform_4, window_bounds = array<i64: 1, 32>}, {transform_indices = @transform_5, window_bounds = array<i64: 64, 32>}]} {
    %c0 = arith.constant 0 : index
    %c0_0 = arith.constant 0 : index
    %0 = vector.load %arg1[%c0, %c0_0] : memref<64x16xf32, #tpu.memory_space<vmem>>, vector<64x16xf32>
    %1 = arith.truncf %0 : vector<64x16xf32> to vector<64x16xbf16>
    %c0_1 = arith.constant 0 : index
    %c0_2 = arith.constant 0 : index
    %2 = vector.load %arg2[%c0_1, %c0_2] : memref<16x32xf32, #tpu.memory_space<vmem>>, vector<16x32xf32>
    %3 = arith.truncf %2 : vector<16x32xf32> to vector<16x32xbf16>
    %c0_3 = arith.constant 0 : index
    %c0_4 = arith.constant 0 : index
    %4 = vector.load %arg4[%c0_3, %c0_4] : memref<32x32xf32, #tpu.memory_space<vmem>>, vector<32x32xf32>
    %5 = arith.truncf %4 : vector<32x32xf32> to vector<32x32xbf16>
    %cst = arith.constant dense<0.000000e+00> : vector<64x32xf32>
    %6 = tpu.matmul %1, %3, %cst {dimension_numbers = #tpu.dot_dimension_numbers<[1], [0], [0], [1], [0, 0, 1, 1], [], []>} : vector<64x16xbf16>, vector<16x32xbf16>, vector<64x32xf32> -> vector<64x32xf32>
    %c0_5 = arith.constant 0 : index
    %c0_6 = arith.constant 0 : index
    %7 = vector.load %arg3[%c0_5, %c0_6] : memref<1x32xf32, #tpu.memory_space<vmem>>, vector<1x32xf32>
    %8 = vector.broadcast %7 : vector<1x32xf32> to vector<64x32xf32>
    %9 = arith.addf %6, %8 : vector<64x32xf32>
    %cst_7 = arith.constant 0.000000e+00 : f32
    %10 = vector.broadcast %cst_7 : f32 to vector<64x32xf32>
    %11 = arith.maximumf %9, %10 : vector<64x32xf32>
    %12 = arith.truncf %11 : vector<64x32xf32> to vector<64x32xbf16>
    %cst_8 = arith.constant dense<0.000000e+00> : vector<64x32xf32>
    %13 = tpu.matmul %12, %5, %cst_8 {dimension_numbers = #tpu.dot_dimension_numbers<[1], [0], [0], [1], [0, 0, 1, 1], [], []>} : vector<64x32xbf16>, vector<32x32xbf16>, vector<64x32xf32> -> vector<64x32xf32>
    %c0_9 = arith.constant 0 : index
    %c0_10 = arith.constant 0 : index
    %14 = vector.load %arg5[%c0_9, %c0_10] : memref<1x32xf32, #tpu.memory_space<vmem>>, vector<1x32xf32>
    %15 = vector.broadcast %14 : vector<1x32xf32> to vector<64x32xf32>
    %16 = arith.addf %13, %15 : vector<64x32xf32>
    %17 = arith.mulf %16, %16 : vector<64x32xf32>
    %cst_11 = arith.constant dense<0.000000e+00> : vector<64xf32>
    %18 = vector.multi_reduction <add>, %17, %cst_11 [1] : vector<64x32xf32> to vector<64xf32>
    %19 = vector.shape_cast %18 : vector<64xf32> to vector<64x1xf32>
    %20 = math.sqrt %19 : vector<64x1xf32>
    %cst_12 = arith.constant 1.000000e-07 : f32
    %21 = vector.broadcast %cst_12 : f32 to vector<64x1xf32>
    %22 = arith.addf %20, %21 : vector<64x1xf32>
    %23 = tpu.reciprocal %22 {approx = true} : vector<64x1xf32> -> vector<64x1xf32>
    %24 = vector.broadcast %23 : vector<64x1xf32> to vector<64x32xf32>
    %25 = arith.mulf %16, %24 : vector<64x32xf32>
    %c0_13 = arith.constant 0 : index
    %c0_14 = arith.constant 0 : index
    %26 = vector.load %arg6[%c0_13, %c0_14] : memref<64x32xf32, #tpu.memory_space<vmem>>, vector<64x32xf32>
    tpu.vector_store %arg6[%c0_13, %c0_14], %25 {strides = array<i32>} : memref<64x32xf32, #tpu.memory_space<vmem>>, vector<64x32xf32>,
    return
  }
  func.func @transform_0(%arg0: i32) -> (i32, i32) {
    %c0_i32 = arith.constant 0 : i32
    %c0_i32_0 = arith.constant 0 : i32
    return %arg0, %c0_i32 : i32, i32
  }
  func.func @transform_1(%arg0: i32) -> (i32, i32) {
    %c0_i32 = arith.constant 0 : i32
    %c0_i32_0 = arith.constant 0 : i32
    %c0_i32_1 = arith.constant 0 : i32
    return %c0_i32, %c0_i32_0 : i32, i32
  }
  func.func @transform_2(%arg0: i32) -> (i32, i32) {
    %c0_i32 = arith.constant 0 : i32
    %c0_i32_0 = arith.constant 0 : i32
    %c0_i32_1 = arith.constant 0 : i32
    return %c0_i32, %c0_i32_0 : i32, i32
  }
  func.func @transform_3(%arg0: i32) -> (i32, i32) {
    %c0_i32 = arith.constant 0 : i32
    %c0_i32_0 = arith.constant 0 : i32
    %c0_i32_1 = arith.constant 0 : i32
    return %c0_i32, %c0_i32_0 : i32, i32
  }
  func.func @transform_4(%arg0: i32) -> (i32, i32) {
    %c0_i32 = arith.constant 0 : i32
    %c0_i32_0 = arith.constant 0 : i32
    %c0_i32_1 = arith.constant 0 : i32
    return %c0_i32, %c0_i32_0 : i32, i32
  }
  func.func @transform_5(%arg0: i32) -> (i32, i32) {
    %c0_i32 = arith.constant 0 : i32
    %c0_i32_0 = arith.constant 0 : i32
    return %arg0, %c0_i32 : i32, i32
  }
}

</mosaic_0001>

<bundles_post_ra>
// kernel: _level_mlp.1
= control target key start
LH: loop header
LB: loop body
LE: loop exit
PB: predicated region body
PF: predicated region fallthrough
CT: control target
= control target key end

     0   :  { %s740_s18 = smov 0   ;;  %s858_s0 = inlined_call_operand.vmem [shape: f32[128,16], index: 0, kind: input, shape index: {}]   ;;  %s859_s1 = inlined_call_operand.vmem [shape: f32[16,32], index: 1, kind: input, shape index: {}]   ;;  %s860_s2 = inlined_call_operand.vmem [shape: f32[1,32], index: 2, kind: input, shape index: {}]   ;;  %s861_s3 = inlined_call_operand.vmem [shape: f32[32,32], index: 3, kind: input, shape index: {}]   ;;  %s862_s4 = inlined_call_operand.vmem [shape: f32[1,32], index: 4, kind: input, shape index: {}]   ;;  %s863_s5 = inlined_call_operand.vmem [shape: f32[128,32], index: 5, kind: output, shape index: {}]  }
   0x1 LB: > { %s608_s19 = sadd.s32 4294967295, %s708_s18   ;;  %p612_p0 = scmp.ge.s32.totalorder %s708_s18, 1  ;;  %s708_s18 = sphi %s740_s18, %s15_s18  }
   0x2   : > { %p188_p1 = scmp.lt.s32.totalorder %s708_s18, 3 }
   0x4   : > { %p189_p2 = pnand %p612_p0, %p188_p1 }
   0x5   : > { %v241_v0 = vld [vmem:[%s859_s1] sm:$0xff] (!%p189_p2)  ;;  %v242_v1 = vld [vmem:[%s859_s1 + $0x8] sm:$0xff] (!%p189_p2)  ;;  %s613_s24 = sshll.u32 (!%p189_p2), %s608_s19, 3  ;;  %vm257_vm0 = vcmask (!%p189_p2), 130048   ;;  %v246_v18 = vld [vmem:[%s861_s3 + $0x10] sm:$0xff] (!%p189_p2)  ;;  %vm354_vm1 = vcmask (!%p189_p2), 261120  }
   0x6   : > { %192 = sbr.rel (%p189_p2) target bundleno = 647 (0x287), region = 40  ;;  %v243_v2 = vpack.c.bf16 (!%p189_p2), %v242_v1, %v241_v0  ;;  %p217_p3 = scmp.lt.s32.totalorder (!%p189_p2), %s613_s24, 15  ;;  %v244_v15 = vld [vmem:[%s861_s3] sm:$0xff] (!%p189_p2)  ;;  %v245_v16 = vld [vmem:[%s861_s3 + $0x8] sm:$0xff] (!%p189_p2)  ;;  %v247_v19 = vld [vmem:[%s861_s3 + $0x18] sm:$0xff] (!%p189_p2) }
   0x7   : > { %v248_v17 = vpack.c.bf16 (!%p189_p2), %v245_v16, %v244_v15  ;;  %v249_v20 = vpack.c.bf16 (!%p189_p2), %v247_v19, %v246_v18  ;;  %v617_v21 = vld [vmem:[%s860_s2] ss:$0 sm:$0xff] (!%p189_p2) }
   0x8   : > { %640 = vmatprep.subr.bf16.mxu0 (!%p189_p2), %v243_v2  ;;  %v622_v50 = vld [vmem:[%s862_s4] ss:$0 sm:$0xff] (!%p189_p2) }
   0x9   : > { %641 = vmatpush3.bf16.msra.mxu0 (!%p189_p2), %v243_v2  ;;  %650 = vmatprep.subr.bf16.mxu1 (!%p189_p2), %v248_v17 }
   0xa   : > { %651 = vmatpush3.bf16.msra.mxu1 (!%p189_p2), %v248_v17 }
   0xb   : > { %652 = vmatprep.subr.bf16.mxu1 (!%p189_p2), %v249_v20 }
   0xd   : > { %s865_s24 = smov (!%p217_p3, %s613_s24), 15 }
   0xe   : > { %s614_s25 = sshll.u32 %s865_s24, 3  ;;  %653 = vmatpush3.bf16.msra.mxu1 %v249_v20 }
   0xf   : > { %s220_s28 = scalar_lea.vmem %s858_s0, %s614_s25  ;;  %s829_s19 = scalar_lea.vmem %s863_s5, %s614_s25 }
  0x10   : > { %v229_v3 = vld [vmem:[%s220_s28] sm:$0xff]  ;;  %v230_v4 = vld [vmem:[%s220_s28 + $0x8] sm:$0xff]  ;;  %v231_v5 = vld [vmem:[%s220_s28 + $0x10] sm:$0xff] }
  0x11   : > { %v237_v6 = vpack.c.bf16 %v230_v4, %v229_v3  ;;  %v232_v7 = vld [vmem:[%s220_s28 + $0x18] sm:$0xff]  ;;  %v233_v8 = vld [vmem:[%s220_s28 + $0x20] sm:$0xff]  ;;  %v234_v9 = vld [vmem:[%s220_s28 + $0x28] sm:$0xff] }
  0x12   : > { %v238_v10 = vpack.c.bf16 %v232_v7, %v231_v5  ;;  %v239_v11 = vpack.c.bf16 %v234_v9, %v233_v8  ;;  %v235_v12 = vld [vmem:[%s220_s28 + $0x30] sm:$0xff]  ;;  %v236_v13 = vld [vmem:[%s220_s28 + $0x38] sm:$0xff] }
  0x13   : > { %642 = vmatprep.mubr.msk.bf16.mxu0 %vm257_vm0, %v237_v6  ;;  %v240_v14 = vpack.c.bf16 %v236_v13, %v235_v12 }
  0x14   : > { %643 = vmatmul.mubr.msk.bf16.vlgmr.msra.gmra.mrb[0].mxu0 %vm257_vm0, %v238_v10 }
  0x15   : > { %646 = vmatprep.mubr.msk.bf16.mxu0 %vm257_vm0, %v239_v11 }
  0x1c   : > { %647 = vmatmul.mubr.msk.bf16.gmra.mrb[4].mxu0 %vm257_vm0, %v240_v14 }
  0xe7   : > { %v644_v22 = vpop.f32.mrb[0].mxu0 }
  0xe8   : > { %v313_v23 = vadd.f32 %v644_v22, %v617_v21  ;;  %v304_v24 = vpop.f32.mrb[1].mxu0 }
  0xe9   : > { %v305_v25 = vadd.f32 %v617_v21, %v304_v24  ;;  %v645_v26 = vpop.f32.mrb[2].mxu0 }
  0xea   : > { %v316_v27 = vadd.f32 %v645_v26, %v617_v21  ;;  %v307_v28 = vpop.f32.mrb[3].mxu0  ;;  %v337_v30 = vmax.f32 %v313_v23, 0.0 }
  0xeb   : > { %v308_v29 = vadd.f32 %v617_v21, %v307_v28  ;;  %v335_v32 = vmax.f32 %v305_v25, 0.0 }
  0xec   : > { %v338_v31 = vmax.f32 %v316_v27, 0.0 }
  0xed   : > { %v336_v33 = vmax.f32 %v308_v29, 0.0 }
  0xee   : > { %v344_v34 = vpack.c.bf16 %v338_v31, %v337_v30 }
  0xef   : > { %v648_v35 = vpop.f32.mrb[4].mxu0  ;;  %v343_v36 = vpack.c.bf16 %v336_v33, %v335_v32 }
  0xf0   : > { %v329_v37 = vadd.f32 %v648_v35, %v617_v21  ;;  %v320_v38 = vpop.f32.mrb[5].mxu0 }
  0xf1   : > { %v321_v39 = vadd.f32 %v617_v21, %v320_v38  ;;  %v649_v40 = vpop.f32.mrb[6].mxu0  ;;  %654 = vmatprep.mubr.msk.bf16.mxu1 %vm354_vm1, %v343_v36 }
  0xf2   : > { %v332_v41 = vadd.f32 %v649_v40, %v617_v21  ;;  %v323_v42 = vpop.f32.mrb[7].mxu0  ;;  %655 = vmatmul.mubr.msk.bf16.vlgmr.msra.gmra.mrb[0].mxu1 %vm354_vm1, %v344_v34  ;;  %v341_v44 = vmax.f32 %v329_v37, 0.0 }
  0xf3   : > { %v324_v43 = vadd.f32 %v617_v21, %v323_v42  ;;  %v339_v46 = vmax.f32 %v321_v39, 0.0 }
  0xf4   : > { %v342_v45 = vmax.f32 %v332_v41, 0.0 }
  0xf5   : > { %v340_v47 = vmax.f32 %v324_v43, 0.0 }
  0xf6   : > { %v346_v48 = vpack.c.bf16 %v342_v45, %v341_v44 }
  0xf7   : > { %v345_v49 = vpack.c.bf16 %v340_v47, %v339_v46 }
  0xf9   : > { %658 = vmatprep.mubr.msk.bf16.mxu1 %vm354_vm1, %v345_v49 }
  0xfa   : > { %659 = vmatmul.mubr.msk.bf16.gmra.mrb[4].mxu1 %vm354_vm1, %v346_v48 }
 0x1c5   : > { %v656_v51 = vpop.f32.mrb[0].mxu1 }
 0x1c6   : > { %v784_v52 = vadd.f32 %v656_v51, %v622_v50  ;;  %v401_v53 = vpop.f32.mrb[1].mxu1 }
 0x1c7   : > { %v786_v54 = vadd.f32 %v622_v50, %v401_v53  ;;  %v657_v55 = vpop.f32.mrb[2].mxu1 }
 0x1c8   : > { %v788_v56 = vadd.f32 %v657_v55, %v622_v50  ;;  %v404_v57 = vpop.f32.mrb[3].mxu1  ;;  %v434_v58 = vmul.f32 %v784_v52, %v784_v52 }
 0x1c9   : > { %v792_v59 = vadd.f32 %v622_v50, %v404_v57  ;;  %v432_v60 = vmul.f32 %v786_v54, %v786_v54 }
 0x1ca   : > { %v446_v61 = vsel %vm354_vm1, %v434_v58, 0.0  ;;  %v435_v62 = vmul.f32 %v788_v56, %v788_v56 }
 0x1cb   : > { %447 = vadd.xlane.f32.xlu1 %v446_v61  ;;  %v440_v63 = vsel %vm354_vm1, %v432_v60, 0.0  ;;  %v433_v0 = vmul.f32 %v792_v59, %v792_v59 }
 0x1cc   : > { %441 = vadd.xlane.f32.xlu0 %v440_v63  ;;  %v449_v3 = vsel %vm354_vm1, %v435_v62, 0.0 }
 0x1cd   : > { %v660_v1 = vpop.f32.mrb[4].mxu1  ;;  %v443_v7 = vsel %vm354_vm1, %v433_v0, 0.0 }
 0x1ce   : > { %v417_v2 = vpop.f32.mrb[5].mxu1  ;;  %v803_v4 = vadd.f32 %v660_v1, %v622_v50 }
 0x1cf   : > { %v805_v5 = vadd.f32 %v622_v50, %v417_v2  ;;  %450 = vadd.xlane.f32.xlu1 %v449_v3  ;;  %v661_v6 = vpop.f32.mrb[6].mxu1 }
 0x1d0   : > { %v420_v8 = vpop.f32.mrb[7].mxu1  ;;  %444 = vadd.xlane.f32.xlu0 %v443_v7  ;;  %v808_v9 = vadd.f32 %v661_v6, %v622_v50  ;;  %v438_v14 = vmul.f32 %v803_v4, %v803_v4 }
 0x1d1   : > { %v810_v10 = vadd.f32 %v622_v50, %v420_v8  ;;  %v436_v11 = vmul.f32 %v805_v5, %v805_v5 }
 0x1d2   : > { %v439_v16 = vmul.f32 %v808_v9, %v808_v9  ;;  %v458_v17 = vsel %vm354_vm1, %v438_v14, 0.0 }
 0x1d3   : > { %v452_v12 = vsel %vm354_vm1, %v436_v11, 0.0  ;;  %v437_v13 = vmul.f32 %v810_v10, %v810_v10 }
 0x1d4   : > { %453 = vadd.xlane.f32.xlu0 %v452_v12  ;;  %v461_v18 = vsel %vm354_vm1, %v439_v16, 0.0 }
 0x1d5   : > { %v455_v15 = vsel %vm354_vm1, %v437_v13, 0.0 }
 0x1d6   : > { %456 = vadd.xlane.f32.xlu1 %v455_v15 }
 0x1d8   : > { %459 = vadd.xlane.f32.xlu0 %v458_v17 }
 0x1da   : > { %462 = vadd.xlane.f32.xlu1 %v461_v18 }
 0x258   : > { %v448_v19 = vpop.xlane.xlu1 %447 }
 0x259   : > { %670 = vrsqrt.f32 %v448_v19  ;;  %v442_v20 = vpop.xlane.xlu0 %441  ;;  %vm480_vm2 = vcmp.eq.f32.partialorder %v448_v19, inf  ;;  %vm482_vm3 = vcmp.eq.f32.partialorder %v448_v19, 0.0  ;;  %v483_v28 = vand.u32 2147483648, %v448_v19 }
 0x25a   : > { %672 = vrsqrt.f32 %v442_v20  ;;  %vm466_vm4 = vcmp.eq.f32.partialorder %v442_v20, inf  ;;  %v469_v32 = vand.u32 2147483648, %v442_v20  ;;  %vm468_vm5 = vcmp.eq.f32.partialorder %v442_v20, 0.0 }
 0x25c   : > { %v451_v21 = vpop.xlane.xlu1 %450 }
 0x25d   : > { %674 = vrsqrt.f32 %v451_v21  ;;  %v445_v22 = vpop.xlane.xlu0 %444  ;;  %vm487_vm6 = vcmp.eq.f32.partialorder %v451_v21, inf  ;;  %vm489_vm7 = vcmp.eq.f32.partialorder %v451_v21, 0.0  ;;  %v490_v42 = vand.u32 2147483648, %v451_v21 }
 0x25e   : > { %676 = vrsqrt.f32 %v445_v22  ;;  %vm473_vm8 = vcmp.eq.f32.partialorder %v445_v22, inf  ;;  %v476_v45 = vand.u32 2147483648, %v445_v22  ;;  %vm475_vm9 = vcmp.eq.f32.partialorder %v445_v22, 0.0 }
 0x261   : > { %v454_v23 = vpop.xlane.xlu0 %453 }
 0x262   : > { %678 = vrsqrt.f32 %v454_v23  ;;  %vm494_vm10 = vcmp.eq.f32.partialorder %v454_v23, inf  ;;  %v497_v57 = vand.u32 2147483648, %v454_v23  ;;  %vm496_vm11 = vcmp.eq.f32.partialorder %v454_v23, 0.0 }
 0x263   : > { %v671_v24 = vpop.eup %670  ;;  %v457_v25 = vpop.xlane.xlu1 %456 }
 0x264   : > { %v673_v26 = vpop.eup %672  ;;  %v479_v27 = vmul.f32 %v671_v24, %v448_v19  ;;  %680 = vrsqrt.f32 %v457_v25  ;;  %vm501_vm12 = vcmp.eq.f32.partialorder %v457_v25, inf  ;;  %v504_v63 = vand.u32 2147483648, %v457_v25 }
 0x265   : > { %v465_v29 = vmul.f32 %v673_v26, %v442_v20  ;;  %v460_v30 = vpop.xlane.xlu0 %459  ;;  %vm503_vm13 = vcmp.eq.f32.partialorder %v457_v25, 0.0 }
 0x266   : > { %v481_v31 = vsel %vm480_vm2, %v448_v19, %v479_v27  ;;  %682 = vrsqrt.f32 %v460_v30  ;;  %vm508_vm14 = vcmp.eq.f32.partialorder %v460_v30, inf  ;;  %vm510_vm15 = vcmp.eq.f32.partialorder %v460_v30, 0.0 }
 0x267   : > { %v675_v33 = vpop.eup %674  ;;  %v484_v34 = vsel %vm482_vm3, %v483_v28, %v481_v31  ;;  %v467_v35 = vsel %vm466_vm4, %v442_v20, %v465_v29  ;;  %v463_v36 = vpop.xlane.xlu1 %462  ;;  %v511_v7 = vand.u32 2147483648, %v460_v30 }
 0x268   : > { %v677_v37 = vpop.eup %676  ;;  %v522_v38 = vadd.f32 1e-07, %v484_v34  ;;  %v470_v39 = vsel %vm468_vm5, %v469_v32, %v467_v35  ;;  %v486_v40 = vmul.f32 %v675_v33, %v451_v21  ;;  %684 = vrsqrt.f32 %v463_v36 }
 0x269   : > { %v520_v41 = vadd.f32 1e-07, %v470_v39  ;;  %v472_v43 = vmul.f32 %v677_v37, %v445_v22  ;;  %vm515_vm0 = vcmp.eq.f32.partialorder %v463_v36, inf  ;;  %vm517_vm2 = vcmp.eq.f32.partialorder %v463_v36, 0.0 }
 0x26a   : > { %686 = vrcp.f32 %v522_v38  ;;  %v488_v44 = vsel %vm487_vm6, %v451_v21, %v486_v40  ;;  %v518_v15 = vand.u32 2147483648, %v463_v36 }
 0x26b   : > { %688 = vrcp.f32 %v520_v41  ;;  %v491_v46 = vsel %vm489_vm7, %v490_v42, %v488_v44  ;;  %v474_v47 = vsel %vm473_vm8, %v445_v22, %v472_v43 }
 0x26c   : > { %v679_v48 = vpop.eup %678  ;;  %v523_v49 = vadd.f32 1e-07, %v491_v46  ;;  %v477_v50 = vsel %vm475_vm9, %v476_v45, %v474_v47 }
 0x26d   : > { %v521_v51 = vadd.f32 1e-07, %v477_v50  ;;  %v493_v53 = vmul.f32 %v679_v48, %v454_v23 }
 0x26e   : > { %v681_v55 = vpop.eup %680  ;;  %690 = vrcp.f32 %v523_v49 }
 0x26f   : > { %692 = vrcp.f32 %v521_v51  ;;  %v495_v58 = vsel %vm494_vm10, %v454_v23, %v493_v53  ;;  %v500_v60 = vmul.f32 %v681_v55, %v457_v25 }
 0x270   : > { %v683_v61 = vpop.eup %682  ;;  %v498_v62 = vsel %vm496_vm11, %v497_v57, %v495_v58 }
 0x271   : > { %v524_v0 = vadd.f32 1e-07, %v498_v62  ;;  %v502_v1 = vsel %vm501_vm12, %v457_v25, %v500_v60  ;;  %v507_v2 = vmul.f32 %v683_v61, %v460_v30 }
 0x272   : > { %v685_v3 = vpop.eup %684  ;;  %v505_v6 = vsel %vm503_vm13, %v504_v63, %v502_v1 }
 0x273   : > { %694 = vrcp.f32 %v524_v0  ;;  %v525_v8 = vadd.f32 1e-07, %v505_v6  ;;  %v509_v11 = vsel %vm508_vm14, %v460_v30, %v507_v2  ;;  %v514_v12 = vmul.f32 %v685_v3, %v463_v36 }
 0x274   : > { %v687_v13 = vpop.eup %686  ;;  %v512_v14 = vsel %vm510_vm15, %v511_v7, %v509_v11 }
 0x275   : > { %v689_v16 = vpop.eup %688  ;;  %v538_v17 = vmul.f32 %v687_v13, %v784_v52  ;;  %696 = vrcp.f32 %v525_v8  ;;  %v526_v18 = vadd.f32 1e-07, %v512_v14  ;;  %v516_v19 = vsel %vm515_vm0, %v463_v36, %v514_v12 }
 0x276   : > { %v536_v20 = vmul.f32 %v689_v16, %v786_v54  ;;  %v519_v21 = vsel %vm517_vm2, %v518_v15, %v516_v19 }
 0x277   : > { %546 = vst.msk [vmem:[%s829_s19 + $0x10] sm:$0xff] %vm354_vm1, %v538_v17  ;;  %698 = vrcp.f32 %v526_v18  ;;  %v527_v22 = vadd.f32 1e-07, %v519_v21 }
 0x278   : > { %v691_v23 = vpop.eup %690  ;;  %544 = vst.msk [vmem:[%s829_s19] sm:$0xff] %vm354_vm1, %v536_v20 }
 0x279   : > { %v693_v24 = vpop.eup %692  ;;  %v539_v52 = vmul.f32 %v691_v23, %v788_v56  ;;  %700 = vrcp.f32 %v527_v22 }
 0x27a   : > { %v537_v25 = vmul.f32 %v693_v24, %v792_v59 }
 0x27b   : > { %547 = vst.msk [vmem:[%s829_s19 + $0x18] sm:$0xff] %vm354_vm1, %v539_v52 }
 0x27c   : > { %545 = vst.msk [vmem:[%s829_s19 + $0x8] sm:$0xff] %vm354_vm1, %v537_v25 }
 0x27d   : > { %v695_v54 = vpop.eup %694 }
 0x27e   : > { %v540_v26 = vmul.f32 %v695_v54, %v805_v5 }
 0x27f   : > { %v697_v27 = vpop.eup %696 }
 0x280   : > { %548 = vst.msk [vmem:[%s829_s19 + $0x20] sm:$0xff] %vm354_vm1, %v540_v26  ;;  %v541_v28 = vmul.f32 %v697_v27, %v810_v10 }
 0x281   : > { %v699_v29 = vpop.eup %698 }
 0x282   : > { %549 = vst.msk [vmem:[%s829_s19 + $0x28] sm:$0xff] %vm354_vm1, %v541_v28  ;;  %v542_v56 = vmul.f32 %v699_v29, %v803_v4 }
 0x283   : > { %v701_v30 = vpop.eup %700 }
 0x284   : > { %550 = vst.msk [vmem:[%s829_s19 + $0x30] sm:$0xff] %vm354_vm1, %v542_v56  ;;  %v543_v59 = vmul.f32 %v701_v30, %v808_v9 }
 0x286   : > { %551 = vst.msk [vmem:[%s829_s19 + $0x38] sm:$0xff] %vm354_vm1, %v543_v59 }
 0x287 PF: > { %s15_s18 = sadd.s32 1, %s708_s18  }
 0x288   : > { %p12_p4 = scmp.ge.s32.totalorder %s15_s18, 4  }
 0x28a   :  { %14 = sbr.rel (!%p12_p4) target bundleno = 1 (0x1), region = 70 }

</bundles_post_ra>
